<compile_context>
chip_gen: v6e
topology: v6e:2x2x1
jax: 0.10.0
libtpu: 0.0.40
codegen_flags: <defaults>
</compile_context>

<pallas_src>
import functools

import jax
import jax.numpy as jnp
from jax.experimental import pallas as pl
from jax.experimental.pallas import tpu as pltpu

NUM_ATOM_TYPE = 120
NUM_BOND_TYPE = 6
BN_EPS = 1e-5


def _round_up(x, m):
    return ((x + m - 1) // m) * m


def _pad_to(a, shape):
    return jnp.pad(a, [(0, s - d) for d, s in zip(a.shape, shape)])


# ----------------------------- Pallas kernel ------------------------------


def gnn_fused_kernel(h0_ref, mask_ref, adj_ref, eagg_ref,
                     w1_ref, b1_ref, w2_ref, b2_ref,
                     gamma_ref, beta_ref,
                     p_ref, invcnt_ref, wp_ref, bp_ref,
                     pred_ref, h_scr, *, n_real):
    layer = pl.program_id(0)
    num_layers = pl.num_programs(0)

    # initialize the persistent node-feature carrier on the first layer
    @pl.when(layer == 0)
    def _init():
        h_scr[...] = h0_ref[...]

    h = h_scr[...]                                                    # [Np, Dp]

    # message passing on the MXU: adjacency aggregation + precomputed per-node
    # edge-embedding aggregate (exactly sum_{e:tgt=i}(h[src(e)] + eemb[e]))
    adj = adj_ref[...].astype(jnp.float32)                            # [Np, Np]
    agg = jnp.dot(adj, h, preferred_element_type=jnp.float32) + eagg_ref[0]

    # GIN MLP: Linear -> ReLU -> Linear
    hid = jnp.dot(agg, w1_ref[0], preferred_element_type=jnp.float32) + b1_ref[0]
    hid = jnp.maximum(hid, 0.0)
    y = jnp.dot(hid, w2_ref[0], preferred_element_type=jnp.float32) + b2_ref[0]

    # BatchNorm1d (training-mode batch statistics), single masked pass so
    # zero-padded node rows never pollute the statistics.
    mask = mask_ref[...]                                              # [Np, 1]
    inv_n = 1.0 / float(n_real)
    ym = y * mask
    mean = jnp.sum(ym, axis=0, keepdims=True) * inv_n
    var = jnp.sum(ym * ym, axis=0, keepdims=True) * inv_n - mean * mean
    y = (y - mean) * jax.lax.rsqrt(var + BN_EPS) * gamma_ref[0] + beta_ref[0]

    is_last = layer == num_layers - 1

    @pl.when(jnp.logical_not(is_last))
    def _intermediate():
        # ReLU on all but the last layer (dropout p=0 -> identity, skipped)
        h_scr[...] = jnp.maximum(y, 0.0)

    @pl.when(is_last)
    def _finalize():
        # global_mean_pool: one-hot pooling matmul, then per-graph 1/count,
        # followed by graph_pred_linear (lane-dense padded output store).
        pooled = jnp.dot(p_ref[...].astype(jnp.float32), y,
                         preferred_element_type=jnp.float32)          # [Gp, Dp]
        pooled = pooled * invcnt_ref[...]
        pred_ref[...] = (jnp.dot(pooled, wp_ref[...],
                                 preferred_element_type=jnp.float32)
                         + bp_ref[...])


def run_fused_gnn(h0, mask, A, eagg_all, w1, b1, w2, b2, gamma, beta,
                  P, invcnt, wp, bp, *, n_real):
    L = eagg_all.shape[0]
    Np, Dp = h0.shape
    Gp = P.shape[0]
    Hp = w1.shape[2]
    Tp = wp.shape[1]

    def resident(shape):           # fetched once, resident across all layers
        zeros = (0,) * len(shape)
        return pl.BlockSpec(shape, lambda l, z=zeros: z)

    def per_layer(shape):          # streamed (double-buffered), one block/layer
        return pl.BlockSpec((1,) + shape, lambda l: (l, 0, 0))

    grid_spec = pltpu.PrefetchScalarGridSpec(
        num_scalar_prefetch=0,
        grid=(L,),
        in_specs=[
            resident((Np, Dp)),      # h0
            resident((Np, 1)),       # node mask
            resident((Np, Np)),      # adjacency (with self loops), bf16
            per_layer((Np, Dp)),     # per-node edge-embedding aggregate
            per_layer((Dp, Hp)),     # W1
            per_layer((1, Hp)),      # b1
            per_layer((Hp, Dp)),     # W2
            per_layer((1, Dp)),      # b2
            per_layer((1, Dp)),      # BN gamma
            per_layer((1, Dp)),      # BN beta
            resident((Gp, Np)),      # pooling operator P
            resident((Gp, 1)),       # 1/count per graph
            resident((Dp, Tp)),      # head weight
            resident((1, Tp)),       # head bias
        ],
        out_specs=pl.BlockSpec((Gp, Tp), lambda l: (0, 0)),
        scratch_shapes=[pltpu.VMEM((Np, Dp), jnp.float32)],   # h carrier
    )

    return pl.pallas_call(
        functools.partial(gnn_fused_kernel, n_real=n_real),
        out_shape=jax.ShapeDtypeStruct((Gp, Tp), jnp.float32),
        grid_spec=grid_spec,
        compiler_params=pltpu.CompilerParams(
            dimension_semantics=("arbitrary",),    # layer axis carries h
            vmem_limit_bytes=64 * 1024 * 1024,
        ),
    )(h0, mask, A, eagg_all, w1, b1, w2, b2, gamma, beta, P, invcnt, wp, bp)


# ----------------------------- parameter init -----------------------------


def xavier_uniform(key, shape):
    fan_out, fan_in = shape
    bound = jnp.sqrt(6.0 / (fan_in + fan_out))
    return jax.random.uniform(key, shape, jnp.float32, -bound, bound)


def linear_init(key, fan_in, fan_out):
    kw, kb = jax.random.split(key)
    bound = 1.0 / jnp.sqrt(float(fan_in))
    w = jax.random.uniform(kw, (fan_in, fan_out), jnp.float32, -bound, bound)
    b = jax.random.uniform(kb, (1, fan_out), jnp.float32, -bound, bound)
    return w, b


def init_params(key, num_layer, emb_dim, num_tasks):
    keys = jax.random.split(key, 3 + 4 * num_layer)
    params = {
        "x_embedding1": xavier_uniform(keys[0], (NUM_ATOM_TYPE, emb_dim)),
        "layers": [],
    }
    ki = 1
    for _ in range(num_layer):
        edge_emb1 = xavier_uniform(keys[ki], (NUM_BOND_TYPE, emb_dim)); ki += 1
        w1, b1 = linear_init(keys[ki], emb_dim, 2 * emb_dim); ki += 1
        w2, b2 = linear_init(keys[ki], 2 * emb_dim, emb_dim); ki += 1
        gamma = jnp.ones((1, emb_dim), jnp.float32)
        beta = jnp.zeros((1, emb_dim), jnp.float32)
        params["layers"].append(
            dict(edge_embedding1=edge_emb1, mlp=(w1, b1, w2, b2, gamma, beta)))
        ki += 1  # reserved key (keeps split count stable)
    params["pred_w"], params["pred_b"] = linear_init(keys[-1], emb_dim, num_tasks)
    return params


# ----------------------------- forward (glue) -----------------------------


def gnn_graphpred_forward(params, x, edge_index, edge_attr, batch, num_graphs):
    emb_dim = params["x_embedding1"].shape[1]
    num_tasks = params["pred_w"].shape[1]
    N = x.shape[0]

    # padded, TPU-friendly sizes
    Dp = _round_up(emb_dim, 128)
    Hp = _round_up(2 * emb_dim, 128)
    Tp = _round_up(num_tasks, 128)
    Np = _round_up(N, 8)
    Gp = _round_up(num_graphs, 8)

    # node embedding: sum over atom-feature dims of x_embedding1 (XLA glue)
    h0 = jnp.zeros((N, emb_dim), jnp.float32)
    for d in range(x.shape[1]):
        h0 = h0 + jnp.take(params["x_embedding1"], x[:, d], axis=0)
    h0 = _pad_to(h0, (Np, Dp))

    node_mask = _pad_to(jnp.ones((N, 1), jnp.float32), (Np, 1))

    # add self loops (self-loop edge attr: first feature = 4)
    self_loops = jnp.arange(N, dtype=edge_index.dtype)
    src = jnp.concatenate([edge_index[0], self_loops])
    tgt = jnp.concatenate([edge_index[1], self_loops])
    self_loop_attr = jnp.zeros((N, edge_attr.shape[1]), edge_attr.dtype)
    self_loop_attr = self_loop_attr.at[:, 0].set(4)
    full_edge_attr = jnp.concatenate([edge_attr, self_loop_attr], axis=0)

    # dense adjacency with edge multiplicity + self loops (small-integer
    # counts are exact in bf16); zero rows/cols for padded nodes.
    A = jnp.zeros((N, N), jnp.float32).at[tgt, src].add(1.0)
    A = _pad_to(A, (Np, Np)).astype(jnp.bfloat16)

    # per-layer per-node edge-embedding aggregates, stacked [L, Np, Dp]:
    #   eagg_l[i] = sum_{e: tgt(e)=i} sum_d edge_embedding1_l[edge_attr[e, d]]
    eagg_layers = []
    for lp in params["layers"]:
        eemb = jnp.zeros((full_edge_attr.shape[0], emb_dim), jnp.float32)
        for d in range(full_edge_attr.shape[1]):
            eemb = eemb + jnp.take(lp["edge_embedding1"],
                                   full_edge_attr[:, d], axis=0)
        eagg = jnp.zeros((N, emb_dim), jnp.float32).at[tgt].add(eemb)
        eagg_layers.append(_pad_to(eagg, (Np, Dp)))
    eagg_all = jnp.stack(eagg_layers)

    # stacked, zero-padded MLP / BN parameters
    w1 = jnp.stack([_pad_to(lp["mlp"][0], (Dp, Hp)) for lp in params["layers"]])
    b1 = jnp.stack([_pad_to(lp["mlp"][1], (1, Hp)) for lp in params["layers"]])
    w2 = jnp.stack([_pad_to(lp["mlp"][2], (Hp, Dp)) for lp in params["layers"]])
    b2 = jnp.stack([_pad_to(lp["mlp"][3], (1, Dp)) for lp in params["layers"]])
    gamma = jnp.stack([_pad_to(lp["mlp"][4], (1, Dp)) for lp in params["layers"]])
    beta = jnp.stack([_pad_to(lp["mlp"][5], (1, Dp)) for lp in params["layers"]])

    # mean-pooling operator (bf16 one-hot, 0/1 exact) and f32 1/count per graph
    P = jax.nn.one_hot(batch, num_graphs, dtype=jnp.float32).T      # [G, N]
    counts = jnp.maximum(jnp.sum(P, axis=1, keepdims=True), 1.0)    # [G, 1]
    invcnt = _pad_to(1.0 / counts, (Gp, 1))
    P = _pad_to(P, (Gp, Np)).astype(jnp.bfloat16)

    # prediction head, padded to a lane-dense (128) output
    wp = _pad_to(params["pred_w"], (Dp, Tp))
    bp = _pad_to(params["pred_b"], (1, Tp))

    pred = run_fused_gnn(h0, node_mask, A, eagg_all,
                         w1, b1, w2, b2, gamma, beta,
                         P, invcnt, wp, bp, n_real=N)
    return pred[:num_graphs, :num_tasks]


# --------------------------------- main ------------------------------------

if __name__ == "__main__":
    num_layer = 2
    emb_dim = 32
    num_tasks = 4
    N = 16           # nodes
    num_graphs = 2   # 8 nodes per graph
    x_dims = 2
    edge_dims = 2

    key = jax.random.PRNGKey(0)
    k_param, k_x, k_e = jax.random.split(key, 3)

    params = init_params(k_param, num_layer, emb_dim, num_tasks)

    # atom features (integers < NUM_ATOM_TYPE)
    x = jax.random.randint(k_x, (N, x_dims), 0, NUM_ATOM_TYPE, dtype=jnp.int32)

    # chain edges within each 8-node graph, both directions
    src_list, tgt_list = [], []
    for g in range(num_graphs):
        base = g * 8
        for i in range(7):
            src_list += [base + i, base + i + 1]
            tgt_list += [base + i + 1, base + i]
    edge_index = jnp.array([src_list, tgt_list], dtype=jnp.int32)   # [2, 28]
    E = edge_index.shape[1]

    # bond features (all dims index edge_embedding1, so keep < NUM_BOND_TYPE)
    edge_attr = jax.random.randint(k_e, (E, edge_dims), 0, NUM_BOND_TYPE,
                                   dtype=jnp.int32)

    batch = jnp.repeat(jnp.arange(num_graphs, dtype=jnp.int32), N // num_graphs)

    out = gnn_graphpred_forward(params, x, edge_index, edge_attr, batch,
                                num_graphs)
    out = jax.block_until_ready(out)
    assert out.shape == (num_graphs, num_tasks)
    assert bool(jnp.all(jnp.isfinite(out)))
    print("KERNEL_OK")
</pallas_src>

<mosaic_0001>
module attributes {stable_mosaic.version = 11 : i64} {
  func.func @gnn_fused_kernel(%arg0: i32, %arg1: memref<16x128xf32, #tpu.memory_space<vmem>>, %arg2: memref<16x1xf32, #tpu.memory_space<vmem>>, %arg3: memref<16x16xbf16, #tpu.memory_space<vmem>>, %arg4: memref<1x16x128xf32, #tpu.memory_space<vmem>>, %arg5: memref<1x128x128xf32, #tpu.memory_space<vmem>>, %arg6: memref<1x1x128xf32, #tpu.memory_space<vmem>>, %arg7: memref<1x128x128xf32, #tpu.memory_space<vmem>>, %arg8: memref<1x1x128xf32, #tpu.memory_space<vmem>>, %arg9: memref<1x1x128xf32, #tpu.memory_space<vmem>>, %arg10: memref<1x1x128xf32, #tpu.memory_space<vmem>>, %arg11: memref<8x16xbf16, #tpu.memory_space<vmem>>, %arg12: memref<8x1xf32, #tpu.memory_space<vmem>>, %arg13: memref<128x128xf32, #tpu.memory_space<vmem>>, %arg14: memref<1x128xf32, #tpu.memory_space<vmem>>, %arg15: memref<8x128xf32, #tpu.memory_space<vmem>>, %arg16: memref<16x128xf32, #tpu.memory_space<vmem>>) attributes {dimension_semantics = [#tpu.dimension_semantics<arbitrary>], iteration_bounds = array<i64: 2>, scalar_prefetch = 0 : i64, scratch_operands = 1 : i64, tpu.core_type = #tpu.core_type<tc>, window_params = [{pipeline_mode = #tpu.pipeline_mode<synchronous>, transform_indices = @transform_0, window_bounds = array<i64: 16, 128>}, {pipeline_mode = #tpu.pipeline_mode<synchronous>, transform_indices = @transform_1, window_bounds = array<i64: 16, 1>}, {pipeline_mode = #tpu.pipeline_mode<synchronous>, transform_indices = @transform_2, window_bounds = array<i64: 16, 16>}, {transform_indices = @transform_3, window_bounds = array<i64: 1, 16, 128>}, {transform_indices = @transform_4, window_bounds = array<i64: 1, 128, 128>}, {transform_indices = @transform_5, window_bounds = array<i64: 1, 1, 128>}, {transform_indices = @transform_6, window_bounds = array<i64: 1, 128, 128>}, {transform_indices = @transform_7, window_bounds = array<i64: 1, 1, 128>}, {transform_indices = @transform_8, window_bounds = array<i64: 1, 1, 128>}, {transform_indices = @transform_9, window_bounds = array<i64: 1, 1, 128>}, {pipeline_mode = #tpu.pipeline_mode<synchronous>, transform_indices = @transform_10, window_bounds = array<i64: 8, 16>}, {pipeline_mode = #tpu.pipeline_mode<synchronous>, transform_indices = @transform_11, window_bounds = array<i64: 8, 1>}, {pipeline_mode = #tpu.pipeline_mode<synchronous>, transform_indices = @transform_12, window_bounds = array<i64: 128, 128>}, {pipeline_mode = #tpu.pipeline_mode<synchronous>, transform_indices = @transform_13, window_bounds = array<i64: 1, 128>}, {pipeline_mode = #tpu.pipeline_mode<synchronous>, transform_indices = @transform_14, window_bounds = array<i64: 8, 128>}]} {
    %c0_i32 = arith.constant 0 : i32
    %0 = arith.cmpi eq, %arg0, %c0_i32 : i32
    %1 = arith.extui %0 : i1 to i32
    %c0_i32_0 = arith.constant 0 : i32
    %2 = arith.cmpi ne, %1, %c0_i32_0 : i32
    scf.if %2 {
      %c0_37 = arith.constant 0 : index
      %c0_38 = arith.constant 0 : index
      %61 = vector.load %arg1[%c0_37, %c0_38] : memref<16x128xf32, #tpu.memory_space<vmem>>, vector<16x128xf32>
      %c0_39 = arith.constant 0 : index
      %c0_40 = arith.constant 0 : index
      %62 = vector.load %arg16[%c0_39, %c0_40] : memref<16x128xf32, #tpu.memory_space<vmem>>, vector<16x128xf32>
      tpu.vector_store %arg16[%c0_39, %c0_40], %61 {strides = array<i32>} : memref<16x128xf32, #tpu.memory_space<vmem>>, vector<16x128xf32>,
    } else {
    }
    %c0 = arith.constant 0 : index
    %c0_1 = arith.constant 0 : index
    %3 = vector.load %arg16[%c0, %c0_1] : memref<16x128xf32, #tpu.memory_space<vmem>>, vector<16x128xf32>
    %c0_2 = arith.constant 0 : index
    %c0_3 = arith.constant 0 : index
    %4 = vector.load %arg3[%c0_2, %c0_3] : memref<16x16xbf16, #tpu.memory_space<vmem>>, vector<16x16xbf16>
    %5 = arith.extf %4 : vector<16x16xbf16> to vector<16x16xf32>
    %cst = arith.constant dense<0.000000e+00> : vector<16x128xf32>
    %6 = tpu.matmul %5, %3, %cst {dimension_numbers = #tpu.dot_dimension_numbers<[1], [0], [0], [1], [0, 0, 1, 1], [], []>} : vector<16x16xf32>, vector<16x128xf32>, vector<16x128xf32> -> vector<16x128xf32>
    %c0_4 = arith.constant 0 : index
    %c0_5 = arith.constant 0 : index
    %c0_6 = arith.constant 0 : index
    %7 = vector.load %arg4[%c0_4, %c0_5, %c0_6] : memref<1x16x128xf32, #tpu.memory_space<vmem>>, vector<1x16x128xf32>
    %8 = vector.shape_cast %7 : vector<1x16x128xf32> to vector<16x128xf32>
    %9 = arith.addf %6, %8 : vector<16x128xf32>
    %c0_7 = arith.constant 0 : index
    %c0_8 = arith.constant 0 : index
    %c0_9 = arith.constant 0 : index
    %10 = vector.load %arg5[%c0_7, %c0_8, %c0_9] : memref<1x128x128xf32, #tpu.memory_space<vmem>>, vector<1x128x128xf32>
    %11 = vector.shape_cast %10 : vector<1x128x128xf32> to vector<128x128xf32>
    %cst_10 = arith.constant dense<0.000000e+00> : vector<16x128xf32>
    %12 = tpu.matmul %9, %11, %cst_10 {dimension_numbers = #tpu.dot_dimension_numbers<[1], [0], [0], [1], [0, 0, 1, 1], [], []>} : vector<16x128xf32>, vector<128x128xf32>, vector<16x128xf32> -> vector<16x128xf32>
    %c0_11 = arith.constant 0 : index
    %c0_12 = arith.constant 0 : index
    %c0_13 = arith.constant 0 : index
    %13 = vector.load %arg6[%c0_11, %c0_12, %c0_13] : memref<1x1x128xf32, #tpu.memory_space<vmem>>, vector<1x1x128xf32>
    %14 = vector.shape_cast %13 : vector<1x1x128xf32> to vector<1x128xf32>
    %15 = vector.broadcast %14 : vector<1x128xf32> to vector<16x128xf32>
    %16 = arith.addf %12, %15 : vector<16x128xf32>
    %cst_14 = arith.constant 0.000000e+00 : f32
    %17 = vector.broadcast %cst_14 : f32 to vector<16x128xf32>
    %18 = arith.maximumf %16, %17 : vector<16x128xf32>
    %c0_15 = arith.constant 0 : index
    %c0_16 = arith.constant 0 : index
    %c0_17 = arith.constant 0 : index
    %19 = vector.load %arg7[%c0_15, %c0_16, %c0_17] : memref<1x128x128xf32, #tpu.memory_space<vmem>>, vector<1x128x128xf32>
    %20 = vector.shape_cast %19 : vector<1x128x128xf32> to vector<128x128xf32>
    %cst_18 = arith.constant dense<0.000000e+00> : vector<16x128xf32>
    %21 = tpu.matmul %18, %20, %cst_18 {dimension_numbers = #tpu.dot_dimension_numbers<[1], [0], [0], [1], [0, 0, 1, 1], [], []>} : vector<16x128xf32>, vector<128x128xf32>, vector<16x128xf32> -> vector<16x128xf32>
    %c0_19 = arith.constant 0 : index
    %c0_20 = arith.constant 0 : index
    %c0_21 = arith.constant 0 : index
    %22 = vector.load %arg8[%c0_19, %c0_20, %c0_21] : memref<1x1x128xf32, #tpu.memory_space<vmem>>, vector<1x1x128xf32>
    %23 = vector.shape_cast %22 : vector<1x1x128xf32> to vector<1x128xf32>
    %24 = vector.broadcast %23 : vector<1x128xf32> to vector<16x128xf32>
    %25 = arith.addf %21, %24 : vector<16x128xf32>
    %c0_22 = arith.constant 0 : index
    %c0_23 = arith.constant 0 : index
    %26 = vector.load %arg2[%c0_22, %c0_23] : memref<16x1xf32, #tpu.memory_space<vmem>>, vector<16x1xf32>
    %27 = vector.broadcast %26 : vector<16x1xf32> to vector<16x128xf32>
    %28 = arith.mulf %25, %27 : vector<16x128xf32>
    %cst_24 = arith.constant dense<0.000000e+00> : vector<128xf32>
    %29 = vector.multi_reduction <add>, %28, %cst_24 [0] : vector<16x128xf32> to vector<128xf32>
    %30 = vector.shape_cast %29 : vector<128xf32> to vector<1x128xf32>
    %cst_25 = arith.constant 6.250000e-02 : f32
    %31 = vector.broadcast %cst_25 : f32 to vector<1x128xf32>
    %32 = arith.mulf %30, %31 : vector<1x128xf32>
    %33 = arith.mulf %28, %28 : vector<16x128xf32>
    %cst_26 = arith.constant dense<0.000000e+00> : vector<128xf32>
    %34 = vector.multi_reduction <add>, %33, %cst_26 [0] : vector<16x128xf32> to vector<128xf32>
    %35 = vector.shape_cast %34 : vector<128xf32> to vector<1x128xf32>
    %cst_27 = arith.constant 6.250000e-02 : f32
    %36 = vector.broadcast %cst_27 : f32 to vector<1x128xf32>
    %37 = arith.mulf %35, %36 : vector<1x128xf32>
    %38 = arith.mulf %32, %32 : vector<1x128xf32>
    %39 = arith.subf %37, %38 : vector<1x128xf32>
    %40 = vector.broadcast %32 : vector<1x128xf32> to vector<16x128xf32>
    %41 = arith.subf %25, %40 : vector<16x128xf32>
    %cst_28 = arith.constant 9.99999974E-6 : f32
    %42 = vector.broadcast %cst_28 : f32 to vector<1x128xf32>
    %43 = arith.addf %39, %42 : vector<1x128xf32>
    %44 = math.rsqrt %43 : vector<1x128xf32>
    %45 = vector.broadcast %44 : vector<1x128xf32> to vector<16x128xf32>
    %46 = arith.mulf %41, %45 : vector<16x128xf32>
    %c0_29 = arith.constant 0 : index
    %c0_30 = arith.constant 0 : index
    %c0_31 = arith.constant 0 : index
    %47 = vector.load %arg9[%c0_29, %c0_30, %c0_31] : memref<1x1x128xf32, #tpu.memory_space<vmem>>, vector<1x1x128xf32>
    %48 = vector.shape_cast %47 : vector<1x1x128xf32> to vector<1x128xf32>
    %49 = vector.broadcast %48 : vector<1x128xf32> to vector<16x128xf32>
    %50 = arith.mulf %46, %49 : vector<16x128xf32>
    %c0_32 = arith.constant 0 : index
    %c0_33 = arith.constant 0 : index
    %c0_34 = arith.constant 0 : index
    %51 = vector.load %arg10[%c0_32, %c0_33, %c0_34] : memref<1x1x128xf32, #tpu.memory_space<vmem>>, vector<1x1x128xf32>
    %52 = vector.shape_cast %51 : vector<1x1x128xf32> to vector<1x128xf32>
    %53 = vector.broadcast %52 : vector<1x128xf32> to vector<16x128xf32>
    %54 = arith.addf %50, %53 : vector<16x128xf32>
    %c1_i32 = arith.constant 1 : i32
    %55 = arith.cmpi eq, %arg0, %c1_i32 : i32
    %true = arith.constant true
    %56 = arith.xori %55, %true : i1
    %57 = arith.extui %56 : i1 to i32
    %c0_i32_35 = arith.constant 0 : i32
    %58 = arith.cmpi ne, %57, %c0_i32_35 : i32
    scf.if %58 {
      %cst_37 = arith.constant 0.000000e+00 : f32
      %61 = vector.broadcast %cst_37 : f32 to vector<16x128xf32>
      %62 = arith.maximumf %54, %61 : vector<16x128xf32>
      %c0_38 = arith.constant 0 : index
      %c0_39 = arith.constant 0 : index
      %63 = vector.load %arg16[%c0_38, %c0_39] : memref<16x128xf32, #tpu.memory_space<vmem>>, vector<16x128xf32>
      tpu.vector_store %arg16[%c0_38, %c0_39], %62 {strides = array<i32>} : memref<16x128xf32, #tpu.memory_space<vmem>>, vector<16x128xf32>,
    } else {
    }
    %59 = arith.extui %55 : i1 to i32
    %c0_i32_36 = arith.constant 0 : i32
    %60 = arith.cmpi ne, %59, %c0_i32_36 : i32
    scf.if %60 {
      %c0_37 = arith.constant 0 : index
      %c0_38 = arith.constant 0 : index
      %61 = vector.load %arg11[%c0_37, %c0_38] : memref<8x16xbf16, #tpu.memory_space<vmem>>, vector<8x16xbf16>
      %62 = arith.extf %61 : vector<8x16xbf16> to vector<8x16xf32>
      %cst_39 = arith.constant dense<0.000000e+00> : vector<8x128xf32>
      %63 = tpu.matmul %62, %54, %cst_39 {dimension_numbers = #tpu.dot_dimension_numbers<[1], [0], [0], [1], [0, 0, 1, 1], [], []>} : vector<8x16xf32>, vector<16x128xf32>, vector<8x128xf32> -> vector<8x128xf32>
      %c0_40 = arith.constant 0 : index
      %c0_41 = arith.constant 0 : index
      %64 = vector.load %arg12[%c0_40, %c0_41] : memref<8x1xf32, #tpu.memory_space<vmem>>, vector<8x1xf32>
      %65 = vector.broadcast %64 : vector<8x1xf32> to vector<8x128xf32>
      %66 = arith.mulf %63, %65 : vector<8x128xf32>
      %c0_42 = arith.constant 0 : index
      %c0_43 = arith.constant 0 : index
      %67 = vector.load %arg13[%c0_42, %c0_43] : memref<128x128xf32, #tpu.memory_space<vmem>>, vector<128x128xf32>
      %cst_44 = arith.constant dense<0.000000e+00> : vector<8x128xf32>
      %68 = tpu.matmul %66, %67, %cst_44 {dimension_numbers = #tpu.dot_dimension_numbers<[1], [0], [0], [1], [0, 0, 1, 1], [], []>} : vector<8x128xf32>, vector<128x128xf32>, vector<8x128xf32> -> vector<8x128xf32>
      %c0_45 = arith.constant 0 : index
      %c0_46 = arith.constant 0 : index
      %69 = vector.load %arg14[%c0_45, %c0_46] : memref<1x128xf32, #tpu.memory_space<vmem>>, vector<1x128xf32>
      %70 = vector.broadcast %69 : vector<1x128xf32> to vector<8x128xf32>
      %71 = arith.addf %68, %70 : vector<8x128xf32>
      %c0_47 = arith.constant 0 : index
      %c0_48 = arith.constant 0 : index
      %72 = vector.load %arg15[%c0_47, %c0_48] : memref<8x128xf32, #tpu.memory_space<vmem>>, vector<8x128xf32>
      tpu.vector_store %arg15[%c0_47, %c0_48], %71 {strides = array<i32>} : memref<8x128xf32, #tpu.memory_space<vmem>>, vector<8x128xf32>,
    } else {
    }
    return
  }
  func.func @transform_0(%arg0: i32) -> (i32, i32) {
    %c0_i32 = arith.constant 0 : i32
    %c0_i32_0 = arith.constant 0 : i32
    %c0_i32_1 = arith.constant 0 : i32
    return %c0_i32, %c0_i32_0 : i32, i32
  }
  func.func @transform_1(%arg0: i32) -> (i32, i32) {
    %c0_i32 = arith.constant 0 : i32
    %c0_i32_0 = arith.constant 0 : i32
    %c0_i32_1 = arith.constant 0 : i32
    return %c0_i32, %c0_i32_0 : i32, i32
  }
  func.func @transform_2(%arg0: i32) -> (i32, i32) {
    %c0_i32 = arith.constant 0 : i32
    %c0_i32_0 = arith.constant 0 : i32
    %c0_i32_1 = arith.constant 0 : i32
    return %c0_i32, %c0_i32_0 : i32, i32
  }
  func.func @transform_3(%arg0: i32) -> (i32, i32, i32) {
    %c0_i32 = arith.constant 0 : i32
    %c0_i32_0 = arith.constant 0 : i32
    %c0_i32_1 = arith.constant 0 : i32
    return %arg0, %c0_i32, %c0_i32_0 : i32, i32, i32
  }
  func.func @transform_4(%arg0: i32) -> (i32, i32, i32) {
    %c0_i32 = arith.constant 0 : i32
    %c0_i32_0 = arith.constant 0 : i32
    %c0_i32_1 = arith.constant 0 : i32
    return %arg0, %c0_i32, %c0_i32_0 : i32, i32, i32
  }
  func.func @transform_5(%arg0: i32) -> (i32, i32, i32) {
    %c0_i32 = arith.constant 0 : i32
    %c0_i32_0 = arith.constant 0 : i32
    %c0_i32_1 = arith.constant 0 : i32
    return %arg0, %c0_i32, %c0_i32_0 : i32, i32, i32
  }
  func.func @transform_6(%arg0: i32) -> (i32, i32, i32) {
    %c0_i32 = arith.constant 0 : i32
    %c0_i32_0 = arith.constant 0 : i32
    %c0_i32_1 = arith.constant 0 : i32
    return %arg0, %c0_i32, %c0_i32_0 : i32, i32, i32
  }
  func.func @transform_7(%arg0: i32) -> (i32, i32, i32) {
    %c0_i32 = arith.constant 0 : i32
    %c0_i32_0 = arith.constant 0 : i32
    %c0_i32_1 = arith.constant 0 : i32
    return %arg0, %c0_i32, %c0_i32_0 : i32, i32, i32
  }
  func.func @transform_8(%arg0: i32) -> (i32, i32, i32) {
    %c0_i32 = arith.constant 0 : i32
    %c0_i32_0 = arith.constant 0 : i32
    %c0_i32_1 = arith.constant 0 : i32
    return %arg0, %c0_i32, %c0_i32_0 : i32, i32, i32
  }
  func.func @transform_9(%arg0: i32) -> (i32, i32, i32) {
    %c0_i32 = arith.constant 0 : i32
    %c0_i32_0 = arith.constant 0 : i32
    %c0_i32_1 = arith.constant 0 : i32
    return %arg0, %c0_i32, %c0_i32_0 : i32, i32, i32
  }
  func.func @transform_10(%arg0: i32) -> (i32, i32) {
    %c0_i32 = arith.constant 0 : i32
    %c0_i32_0 = arith.constant 0 : i32
    %c0_i32_1 = arith.constant 0 : i32
    return %c0_i32, %c0_i32_0 : i32, i32
  }
  func.func @transform_11(%arg0: i32) -> (i32, i32) {
    %c0_i32 = arith.constant 0 : i32
    %c0_i32_0 = arith.constant 0 : i32
    %c0_i32_1 = arith.constant 0 : i32
    return %c0_i32, %c0_i32_0 : i32, i32
  }
  func.func @transform_12(%arg0: i32) -> (i32, i32) {
    %c0_i32 = arith.constant 0 : i32
    %c0_i32_0 = arith.constant 0 : i32
    %c0_i32_1 = arith.constant 0 : i32
    return %c0_i32, %c0_i32_0 : i32, i32
  }
  func.func @transform_13(%arg0: i32) -> (i32, i32) {
    %c0_i32 = arith.constant 0 : i32
    %c0_i32_0 = arith.constant 0 : i32
    %c0_i32_1 = arith.constant 0 : i32
    return %c0_i32, %c0_i32_0 : i32, i32
  }
  func.func @transform_14(%arg0: i32) -> (i32, i32) {
    %c0_i32 = arith.constant 0 : i32
    %c0_i32_0 = arith.constant 0 : i32
    %c0_i32_1 = arith.constant 0 : i32
    return %c0_i32, %c0_i32_0 : i32, i32
  }
}

</mosaic_0001>

<bundles_post_ra>
// kernel: tpu_custom_call.1
= control target key start
LH: loop header
LB: loop body
LE: loop exit
PB: predicated region body
PF: predicated region fallthrough
CT: control target
= control target key end

     0   :  { %s2220_s0 = inlined_call_operand.vmem [shape: f32[16,128], index: 0, kind: input, shape index: {}]   ;;  %s2221_s1 = inlined_call_operand.vmem [shape: f32[16,1], index: 1, kind: input, shape index: {}]   ;;  %s2222_s2 = inlined_call_operand.vmem [shape: bf16[16,16], index: 2, kind: input, shape index: {}]   ;;  %s2223_s3 = inlined_call_operand.hbm [shape: f32[2,16,128], index: 3, kind: input, shape index: {}]   ;;  %s2224_s4 = inlined_call_operand.hbm [shape: f32[2,128,128], index: 4, kind: input, shape index: {}]   ;;  %s2225_s5 = inlined_call_operand.vmem [shape: f32[2,1,128], index: 5, kind: input, shape index: {}]   ;;  %s2226_s6 = inlined_call_operand.hbm [shape: f32[2,128,128], index: 6, kind: input, shape index: {}]   ;;  %s2227_s7 = inlined_call_operand.vmem [shape: f32[2,1,128], index: 7, kind: input, shape index: {}]   ;;  %s2228_s8 = inlined_call_operand.vmem [shape: f32[2,1,128], index: 8, kind: input, shape index: {}]   ;;  %s2229_s9 = inlined_call_operand.vmem [shape: f32[2,1,128], index: 9, kind: input, shape index: {}]   ;;  %s2230_s10 = inlined_call_operand.vmem [shape: bf16[8,16], index: 10, kind: input, shape index: {}]   ;;  %s2231_s11 = inlined_call_operand.vmem [shape: f32[8,1], index: 11, kind: input, shape index: {}]   ;;  %s2232_s12 = inlined_call_operand.hbm [shape: f32[128,128], index: 12, kind: input, shape index: {}]   ;;  %s2233_s13 = inlined_call_operand.vmem [shape: f32[1,128], index: 13, kind: input, shape index: {}]   ;;  %s2234_s14 = inlined_call_operand.hbm [shape: f32[8,128], index: 14, kind: output, shape index: {}]  }
   0x1   :  { %2249 = sst [smem:[#allocation19_spill]] %s2220_s0 }
   0x2   :  { %2250 = sst [smem:[#allocation20_spill]] %s2221_s1 }
   0x3   :  { %2251 = sst [smem:[#allocation21_spill]] %s2222_s2 }
   0x4   :  { %2252 = sst [smem:[#allocation22_spill]] %s2224_s4 }
   0x5   :  { %2253 = sst [smem:[#allocation23_spill]] %s2230_s10 }
   0x6   :  { %2254 = sst [smem:[#allocation24_spill]] %s2231_s11 }
   0x7   :  { %2255 = sst [smem:[#allocation25_spill]] %s2233_s13 }
   0x8   :  { %2256 = sst [smem:[#allocation26_spill]] %s2234_s14 }
   0x9   :  { %19 = vsyncpa [#allocation4], 0 }
   0xa   :  { %21 = vsyncpa [#allocation4 + $0x1], 0 }
   0xb   :  { %22 = vsyncpa [#allocation7], 0 }
   0xc   :  { %24 = vsyncpa [#allocation7 + $0x1], 0 }
   0xd   :  { %25 = vsyncpa [#allocation10], 0 }
   0xe   :  { %26 = vsyncpa [#allocation5], 0  ;;  %s1874_s29 = smov 0   ;;  %s1876_s30 = smov 0  }
   0xf   :  { %s1878_s15 = smov 0   ;;  %s1880_s16 = smov 0  }
  0x10 LB: > { %2257 = sst [smem:[#allocation16_spill]] %s1782_s15  ;;  %s1895_s17 = sadd.s32 1, %s1786_s16   ;;  %s1786_s16 = sphi %s1880_s16, %s2283_s16   ;;  %s1782_s15 = sphi %s1878_s15, %s2285_s15   ;;  %s1778_s30 = sphi %s1876_s30, %s2287_s30   ;;  %s1774_s29 = sphi %s1874_s29, %s2286_s29  }
  0x11   : > { %2258 = sst [smem:[#allocation17_spill]] %s1895_s17  ;;  %s102_s18 = sadd.s32 1, %s1782_s15 }
  0x12   : > { %s99_s19 = ssub.s32 %s1786_s16, %s1895_s17  ;;  %p109_p0 = scmp.ne.s32.totalorder %s1782_s15, %s1778_s30 }
  0x13   : > { %p100_p1 = scmp.eq.s32.totalorder %s99_s19, 0  ;;  %p110_p2 = scmp.eq.s32.totalorder %s1786_s16, 0 }
  0x14   : > { %p1558_p4 = scmp.lt.s32.totalorder %s1786_s16, 2  ;;  %s1908_s21 = sand.u32 1, %s1782_s15  }
  0x15   : > { %s1904_s20 = scalar_select %p100_p1, %s1782_s15, %s102_s18  }
  0x16   : > { %p111_p3 = por %p110_p2, %p109_p0  ;;  %s452_s22 = sand.u32 1, %s1786_s16  }
  0x17   : > { %2259 = sst [smem:[#allocation18_spill]] %s1904_s20  ;;  %s2238_s23 = sshll.u32 %s1908_s21, 7 }
  0x18   : > { %p1912_p5 = pnand %p1558_p4, %p111_p3  ;;  %s2239_s25 = sshll.u32 %s1786_s16, 11 }
  0x19   : > { %s2261_s4 = sld [smem:[#allocation22_spill]]  ;;  %s456_s18 = scalar_lea.vmem [#allocation6], %s2238_s23 }
  0x1a   : > { %s463_s19 = sshll.u32 %s456_s18, 4  ;;  %s1928_s20 = scalar_lea.sflag [#allocation7], %s452_s22  ;;  %s1926_s19 = int_to_ptr.vmem [resolvable:$true] %s463_s19 }
  0x1b   : > { %p1934_p7 = pneg %p1912_p5 }
  0x1f   : > { %s1922_s28 = scalar_lea.hbm %s2261_s4, %s2239_s25  ;;  %s1611_s23 = scalar_lea.hbm %s2261_s4, 4096 }
  0x20   : > { %s1606_s15 = scalar_lea.hbm %s1922_s28, 2048  ;;  %p1612_p10 = scmp.lt.s32.totalorder %s1922_s28, %s2261_s4 }
  0x21   : > { %p1607_p6 = scmp.ne.s32.totalorder %s1922_s28, %s1606_s15  ;;  %p1613_p11 = scmp.lt.s32.totalorder %s1611_s23, %s1606_s15 }
  0x23   : > { %p1609_p8 = pnand %p1934_p7, %p1607_p6  ;;  %p1614_p12 = por %p1613_p11, %p1612_p10 }
  0x25   : > { %p1610_p9 = pneg %p1609_p8 }
  0x27   : > { %p1615_p13 = pnand %p1614_p12, %p1610_p9 }
  0x29   : > { %1618 = shalt.err (!%p1615_p13)
}
  0x2a   : > { %s1619_s22 = scalar_lea.vmem %s1926_s19, 2048  ;;  %s1788_s14 = smov [#allocation6]  }
  0x2b   : > { %p1620_p0 = scmp.ne.s32.totalorder %s1926_s19, %s1619_s22  ;;  %s1624_s26 = sshll.u32 %s1788_s14, 4  ;;  %s1625_s26 = int_to_ptr.vmem [resolvable:$false] %s1624_s26 }
  0x2c   : > { %s1626_s27 = scalar_lea.vmem %s1625_s26, 4096  ;;  %p1627_p3 = scmp.lt.s32.totalorder %s1926_s19, %s1625_s26 }
  0x2d   : > { %p1622_p1 = pnand %p1620_p0, %p1934_p7  ;;  %p1628_p4 = scmp.lt.s32.totalorder %s1626_s27, %s1619_s22 }
  0x2f   : > { %p1623_p2 = pneg %p1622_p1  ;;  %p1629_p6 = por %p1628_p4, %p1627_p3 }
  0x31   : > { %p1630_p8 = pnand %p1629_p6, %p1623_p2 }
  0x33   : > { %1633 = shalt.err (!%p1630_p8)
}
  0x34   : > { %s2240_s15 = smov 128   ;;  %s2242_s14 = smov 8  }
  0x35   : > { %1553 = dma.hbm_to_vmem [thread:$0]  (!%p1912_p5), %s1922_s28, 2048, %s1926_s19, %s1928_s20, %s2240_s15, %s2240_s15, %s2242_s14  }
  0x36   : > { %s2263_s23 = sshll.u32 %s1786_s16, 11  ;;  %s2264_s26 = sshll.u32 %s1908_s21, 7 }
  0x37   : > { %s1965_s22 = scalar_lea.hbm %s2226_s6, %s2263_s23  ;;  %s483_s27 = scalar_lea.vmem [#allocation8], %s2264_s26 }
  0x38   : > { %s490_s4 = sshll.u32 %s483_s27, 4  ;;  %s1970_s13 = sadd.s32 4294967295, %s1786_s16   ;;  %s1988_s4 = int_to_ptr.vmem [resolvable:$true] %s490_s4 }
  0x39   : > { %p115_p9 = scmp.ne.s32.totalorder %s1778_s30, %s1774_s29  ;;  %p2246_p10 = scmp.eq.s32.totalorder %s1970_s13, 0 }
  0x3a   : > { %p1311_p11 = scmp.ge.s32.totalorder %s1786_s16, 1  ;;  %p387_p12 = scmp.lt.s32.totalorder %s1786_s16, 3 }
  0x3b   : > { %p1980_p0 = por %p2246_p10, %p115_p9  ;;  %s1791_s23 = smov [#allocation9]  }
  0x3c   : > { %p1984_p1 = pnand %p1311_p11, %p387_p12  ;;  %s414_s25 = sshll.u32 %s1791_s23, 4  ;;  %s415_s25 = int_to_ptr.vmem [resolvable:$true] %s414_s25 }
  0x3d   : > { %s2265_s28 = scalar_select %p1980_p0, 1, 0 }
  0x3e   : > { %s2266_s19 = scalar_select %p1984_p1, 1, 0 }
  0x3f   : > { %p1543_p2 = pneg %p1984_p1  ;;  %s1314_s29 = sshll.u32 %s1908_s21, 4 }
  0x40   : > { %s1343_s18 = sshll.u32 %s1786_s16, 8  ;;  %s435_s11 = scalar_lea.vmem [#allocation3], %s1314_s29 }
  0x41   : > { %p1996_p3 = pnand %p1543_p2, %p2246_p10  ;;  %s2003_s14 = scalar_lea.hbm %s2223_s3, %s1343_s18 }
  0x42   : > { %s442_s23 = sshll.u32 %s435_s11, 4  ;;  %s1645_s10 = scalar_lea.vmem %s415_s25, 2048  ;;  %s2005_s23 = int_to_ptr.vmem [resolvable:$true] %s442_s23 }
  0x43   : > { %p1636_p4 = pneg %p1996_p3  ;;  %p1646_p6 = scmp.ne.s32.totalorder %s415_s25, %s1645_s10 }
  0x44   : > { %p1653_p11 = scmp.lt.s32.totalorder %s415_s25, %s415_s25  ;;  %p1654_p12 = scmp.lt.s32.totalorder %s1645_s10, %s1645_s10 }
  0x45   : > { %p1648_p8 = pnand %p1646_p6, %p1636_p4 }
  0x46   : > { %p1655_p2 = por %p1654_p12, %p1653_p11 }
  0x47   : > { %p1649_p9 = pneg %p1648_p8 }
  0x49   : > { %p1656_p13 = pnand %p1655_p2, %p1649_p9 }
  0x4b   : > { %1659 = shalt.err (!%p1656_p13)
}
  0x4c   : > { %s2268_s16 = smov 8   ;;  %s2269_s15 = smov 128  }
  0x4d   : > { %1546 = dma.hbm_to_vmem [thread:$0]  (!%p1996_p3), %s2232_s12, 2048, %s415_s25, [#allocation10], %s2269_s15, %s2269_s15, %s2268_s16  }
  0x4e   : > { %s432_s18 = scalar_lea.sflag [#allocation4], %s1908_s21  ;;  %s1660_s27 = scalar_lea.hbm %s2003_s14, 256 }
  0x4f   : > { %p1661_p4 = scmp.ne.s32.totalorder %s2003_s14, %s1660_s27  ;;  %s1665_s1 = scalar_lea.hbm %s2223_s3, 512 }
  0x50   : > { %p1666_p8 = scmp.lt.s32.totalorder %s2003_s14, %s2223_s3  ;;  %p1667_p9 = scmp.lt.s32.totalorder %s1665_s1, %s1660_s27 }
  0x51   : > { %p1663_p6 = pnand %p1661_p4, %p1934_p7 }
  0x52   : > { %p1668_p11 = por %p1667_p9, %p1666_p8 }
  0x53   : > { %p1664_p13 = pneg %p1663_p6 }
  0x55   : > { %p1669_p12 = pnand %p1668_p11, %p1664_p13 }
  0x57   : > { %1672 = shalt.err (!%p1669_p12)
}
  0x58   : > { %s1673_s21 = scalar_lea.vmem %s2005_s23, 256  ;;  %s1792_s25 = smov [#allocation3]  }
  0x59   : > { %p1674_p3 = scmp.ne.s32.totalorder %s2005_s23, %s1673_s21  ;;  %s1678_s29 = sshll.u32 %s1792_s25, 4  ;;  %s1679_s29 = int_to_ptr.vmem [resolvable:$false] %s1678_s29 }
  0x5a   : > { %s1680_s11 = scalar_lea.vmem %s1679_s29, 512  ;;  %p1681_p6 = scmp.lt.s32.totalorder %s2005_s23, %s1679_s29 }
  0x5b   : > { %p1676_p2 = pnand %p1674_p3, %p1934_p7  ;;  %p1682_p10 = scmp.lt.s32.totalorder %s1680_s11, %s1673_s21 }
  0x5d   : > { %p1677_p4 = pneg %p1676_p2  ;;  %p1683_p0 = por %p1682_p10, %p1681_p6 }
  0x5f   : > { %p1684_p1 = pnand %p1683_p0, %p1677_p4 }
  0x61   : > { %1687 = shalt.err (!%p1684_p1)
}
  0x62   : > { %1550 = dma.hbm_to_vmem [thread:$0]  (!%p1912_p5), %s2003_s14, 256, %s2005_s23, %s432_s18, %s2269_s15, %s2269_s15, %s2268_s16  }
  0x63   : > { %s1688_s0 = scalar_lea.hbm %s1965_s22, 2048  ;;  %s1693_s27 = scalar_lea.hbm %s2226_s6, 4096 }
  0x64   : > { %p1689_p13 = scmp.ne.s32.totalorder %s1965_s22, %s1688_s0  ;;  %p1694_p10 = scmp.lt.s32.totalorder %s1965_s22, %s2226_s6 }
  0x65   : > { %p1695_p0 = scmp.lt.s32.totalorder %s1693_s27, %s1688_s0 }
  0x66   : > { %p1691_p8 = pnand %p1689_p13, %p1934_p7 }
  0x67   : > { %p1696_p1 = por %p1695_p0, %p1694_p10 }
  0x68   : > { %p1692_p9 = pneg %p1691_p8 }
  0x6a   : > { %p1697_p11 = pnand %p1696_p1, %p1692_p9 }
  0x6c   : > { %1700 = shalt.err (!%p1697_p11)
}
  0x6d   : > { %s1701_s14 = scalar_lea.vmem %s1988_s4, 2048  ;;  %s1793_s23 = smov [#allocation8]  }
  0x6e   : > { %p1702_p12 = scmp.ne.s32.totalorder %s1988_s4, %s1701_s14  ;;  %s1706_s18 = sshll.u32 %s1793_s23, 4  ;;  %s1707_s18 = int_to_ptr.vmem [resolvable:$false] %s1706_s18 }
  0x6f   : > { %s1708_s21 = scalar_lea.vmem %s1707_s18, 4096  ;;  %p1709_p4 = scmp.lt.s32.totalorder %s1988_s4, %s1707_s18 }
  0x70   : > { %p1704_p3 = pnand %p1702_p12, %p1934_p7  ;;  %p1710_p6 = scmp.lt.s32.totalorder %s1708_s21, %s1701_s14 }
  0x72   : > { %p1705_p2 = pneg %p1704_p3  ;;  %p1711_p13 = por %p1710_p6, %p1709_p4 }
  0x74   : > { %p1712_p8 = pnand %p1711_p13, %p1705_p2 }
  0x76   : > { %1715 = shalt.err (!%p1712_p8)
}
  0x77   : > { %1556 = dma.hbm_to_vmem [thread:$0]  (!%p1912_p5), %s1965_s22, 2048, %s1988_s4, %s1928_s20, %s2269_s15, %s2269_s15, %s2268_s16  }
  0x78   : > { %p2270_p7 = scmp.ne.s32.totalorder %s2266_s19, 0 }
  0x79   : > { %s522_s17 = sand.u32 (!%p2270_p7), 1, %s1778_s30   ;;  %p2271_p9 = scmp.ne.s32.totalorder (!%p2270_p7), %s2265_s28, 0 }
  0x7a   : > { %520 = sbr.rel (%p2270_p7) target bundleno = 1221 (0x4c5), region = 76  ;;  %s1324_s25 = sshll.u32 (!%p2270_p7), %s522_s17, 4 }
  0x7b   : > { %s523_s29 = scalar_lea.sflag (!%p2270_p7), [#allocation4], %s522_s17  ;;  %s2068_s11 = scalar_lea.vmem (!%p2270_p7), [#allocation3], %s1324_s25 }
  0x7f   : > { %1757 = dma.done.wait (%p2271_p9), %s523_s29, 256  }
  0x80   : > { %1759 = vsyncadd (%p2271_p9), %s523_s29, 4294967040  ;;  %s531_s24 = sand.u32 1, %s1970_s13   ;;  %s1325_s0 = sshll.u32 %s522_s17, 7 }
  0x81   : > { %s532_s4 = scalar_lea.sflag [#allocation7], %s531_s24  ;;  %s2075_s20 = scalar_lea.vmem [#allocation6], %s1325_s0 }
  0x82   : > { %1761 = dma.done.wait (%p2271_p9), %s532_s4, 4096  }
  0x83   : > { %1763 = vsyncadd (%p2271_p9), %s532_s4, 4294963200  ;;  %s2081_s22 = scalar_lea.vmem [#allocation8], %s1325_s0  ;;  %p2272_p5 = scmp.eq.s32.totalorder %s1970_s13, 0 }
  0x85   : > { %1765 = dma.done.wait (%p2272_p5), [#allocation10], 2048   ;;  %p2273_p10 = pmov %p2272_p5 }
  0x86   : > { %p610_p0 = scmp.lt.s32.totalorder %s1970_s13, 1  ;;  %p2274_p1 = scmp.ne.s32.totalorder %s1970_s13, 0 }
  0x87   : > { %1767 = vsyncadd (%p2273_p10), [#allocation10], 4294965248  ;;  %s2275_s29 = sld [smem:[#allocation19_spill]] (!%p2274_p1) }
  0x88   : > { %s2089_s19 = scalar_select %p610_p0, %s1970_s13, 1 }
  0x89   : > { %625 = sbr.rel (%p2274_p1) target bundleno = 144 (0x90), region = 96 }
  0x8a   : > { %s612_s28 = scalar_lea.vmem %s2225_s5, %s2089_s19  ;;  %s615_s27 = scalar_lea.vmem %s2227_s7, %s2089_s19 }
  0x8b   : > { %s618_s14 = scalar_lea.vmem %s2228_s8, %s2089_s19  ;;  %s621_s21 = scalar_lea.vmem %s2229_s9, %s2089_s19 }
  0x8d   : > { %s2276_s24 = smov (!%p2274_p1), %s2275_s29 }
  0x8e   : > { %v626_v0 = vld [vmem:[%s2275_s29] sm:$0xff]  ;;  %v627_v1 = vld [vmem:[%s2276_s24 + $0x8] sm:$0xff] }
  0x8f   : > { %628 = vst [vmem:[#allocation2] sm:$0xff] %v626_v0  ;;  %629 = vst [vmem:[#allocation2 + $0x8] sm:$0xff] %v627_v1 }
  0x90 PF: > { %s2277_s1 = sld [smem:[#allocation21_spill]]  ;;  %vm638_vm0 = vcmask 130048   ;;  %v735_v7 = vld [vmem:[%s2075_s20 + $0x78] sm:$0xff]  ;;  %v734_v8 = vld [vmem:[%s2075_s20 + $0x70] sm:$0xff]  ;;  %v733_v9 = vld [vmem:[%s2075_s20 + $0x68] sm:$0xff]  ;;  %v1794_v46 = vmov 0  }
  0x91   : > { %1417 = vmatprep.subr.mxu1 %v735_v7  ;;  %v732_v10 = vld [vmem:[%s2075_s20 + $0x60] sm:$0xff]  ;;  %v731_v11 = vld [vmem:[%s2075_s20 + $0x58] sm:$0xff]  ;;  %v730_v12 = vld [vmem:[%s2075_s20 + $0x50] sm:$0xff]  ;;  %s2278_s2 = sld [smem:[#allocation20_spill]]  ;;  %1602 = vset.pattern.permute.xlu0 %v1794_v46  ;;  %p1335_p11 = scmp.eq.s32.totalorder %s1970_s13, 1 }
  0x92   : > { %1418 = vmatpush3.msra.mxu1 %v735_v7  ;;  %v729_v13 = vld [vmem:[%s2075_s20 + $0x48] sm:$0xff]  ;;  %v728_v14 = vld [vmem:[%s2075_s20 + $0x40] sm:$0xff]  ;;  %v727_v15 = vld [vmem:[%s2075_s20 + $0x38] sm:$0xff] }
  0x93   : > { %1419 = vmatprep.subr.mxu1 %v734_v8  ;;  %v726_v16 = vld [vmem:[%s2075_s20 + $0x30] sm:$0xff]  ;;  %v725_v17 = vld [vmem:[%s2075_s20 + $0x28] sm:$0xff]  ;;  %v724_v18 = vld [vmem:[%s2075_s20 + $0x20] sm:$0xff] }
  0x94   : > { %1420 = vmatpush3.msra.mxu1 %v734_v8  ;;  %v723_v19 = vld [vmem:[%s2075_s20 + $0x18] sm:$0xff]  ;;  %v722_v20 = vld [vmem:[%s2075_s20 + $0x10] sm:$0xff]  ;;  %v721_v21 = vld [vmem:[%s2075_s20 + $0x8] sm:$0xff] }
  0x95   : > { %1421 = vmatprep.subr.mxu1 %v733_v9  ;;  %v720_v22 = vld [vmem:[%s2075_s20] sm:$0xff]  ;;  %v835_v23 = vld [vmem:[%s2081_s22 + $0x78] sm:$0xff]  ;;  %v834_v24 = vld [vmem:[%s2081_s22 + $0x70] sm:$0xff] }
  0x96   : > { %v631_v2 = vld [vmem:[#allocation2 + $0x8] sm:$0xff]  ;;  %v630_v3 = vld [vmem:[#allocation2] sm:$0xff]  ;;  %1422 = vmatpush3.msra.mxu1 %v733_v9  ;;  %v833_v25 = vld [vmem:[%s2081_s22 + $0x68] sm:$0xff] }
  0x97   : > { %v1347_v4 = vld [vmem:[%s2277_s1] sm:$0xff]   ;;  %1410 = vmatprep.subr.mxu0 %v631_v2  ;;  %1423 = vmatprep.subr.mxu1 %v732_v10  ;;  %v832_v26 = vld [vmem:[%s2081_s22 + $0x60] sm:$0xff]  ;;  %v831_v27 = vld [vmem:[%s2081_s22 + $0x58] sm:$0xff] }
  0x98   : > { %v1348_v5 = vunpack.c.l.bf16 %v1347_v4  ;;  %v1349_v6 = vunpack.c.h.bf16 %v1347_v4  ;;  %1411 = vmatpush3.msra.mxu0 %v631_v2  ;;  %1424 = vmatpush3.msra.mxu1 %v732_v10  ;;  %v830_v28 = vld [vmem:[%s2081_s22 + $0x50] sm:$0xff]  ;;  %v829_v29 = vld [vmem:[%s2081_s22 + $0x48] sm:$0xff]  ;;  %v828_v30 = vld [vmem:[%s2081_s22 + $0x40] sm:$0xff] }
  0x99   : > { %1412 = vmatprep.subr.mxu0 %v630_v3  ;;  %1425 = vmatprep.subr.mxu1 %v731_v11  ;;  %v827_v31 = vld [vmem:[%s2081_s22 + $0x38] sm:$0xff]  ;;  %v826_v32 = vld [vmem:[%s2081_s22 + $0x30] sm:$0xff]  ;;  %v825_v33 = vld [vmem:[%s2081_s22 + $0x28] sm:$0xff] }
  0x9a   : > { %1414 = vmatprep.mubr.msk.f32.mxu0 %vm638_vm0, %v1348_v5  ;;  %1413 = vmatpush3.msra.mxu0 %v630_v3  ;;  %v824_v34 = vld [vmem:[%s2081_s22 + $0x20] sm:$0xff]  ;;  %v637_v37 = vld [vmem:[%s2068_s11 + $0x8] sm:$0xff]  ;;  %v822_v42 = vld [vmem:[%s2081_s22 + $0x10] sm:$0xff] }
  0x9b   : > { %1415 = vmatmul.mubr.msk.f32.vlgmr.msra.gmra.mxu0 %vm638_vm0, %v1349_v6  ;;  %1426 = vmatpush3.msra.mxu1 %v731_v11  ;;  %v636_v36 = vld [vmem:[%s2068_s11] sm:$0xff]  ;;  %v823_v41 = vld [vmem:[%s2081_s22 + $0x18] sm:$0xff]  ;;  %v821_v43 = vld [vmem:[%s2081_s22 + $0x8] sm:$0xff] }
  0x9c   : > { %1427 = vmatprep.subr.mxu1 %v730_v12  ;;  %1452 = vmatprep.subr.mxu0 %v835_v23  ;;  %v820_v44 = vld [vmem:[%s2081_s22] sm:$0xff]  ;;  %v918_v45 = vld [vmem:[%s2278_s2] sm:$0xff]  ;;  %v919_v47 = vld [vmem:[%s2278_s2 + $0x8] sm:$0xff] }
  0x9d   : > { %1428 = vmatpush3.msra.mxu1 %v730_v12  ;;  %1453 = vmatpush3.msra.mxu0 %v835_v23  ;;  %v1331_v48 = vld [vmem:[%s612_s28] ss:$0 sm:$0xff] }
  0x9e   : > { %1429 = vmatprep.subr.mxu1 %v729_v13  ;;  %1454 = vmatprep.subr.mxu0 %v834_v24  ;;  %v1332_v56 = vld [vmem:[%s615_s27] ss:$0 sm:$0xff] }
  0x9f   : > { %1430 = vmatpush3.msra.mxu1 %v729_v13  ;;  %1455 = vmatpush3.msra.mxu0 %v834_v24  ;;  %v1333_v24 = vld [vmem:[%s618_s14] ss:$0 sm:$0xff] }
  0xa0   : > { %1431 = vmatprep.subr.mxu1 %v728_v14  ;;  %1456 = vmatprep.subr.mxu0 %v833_v25 }
  0xa1   : > { %1432 = vmatpush3.msra.mxu1 %v728_v14  ;;  %1457 = vmatpush3.msra.mxu0 %v833_v25 }
  0xa2   : > { %1433 = vmatprep.subr.mxu1 %v727_v15  ;;  %1458 = vmatprep.subr.mxu0 %v832_v26 }
  0xa3   : > { %1434 = vmatpush3.msra.mxu1 %v727_v15  ;;  %1459 = vmatpush3.msra.mxu0 %v832_v26 }
  0xa4   : > { %1435 = vmatprep.subr.mxu1 %v726_v16  ;;  %1460 = vmatprep.subr.mxu0 %v831_v27 }
  0xa5   : > { %1436 = vmatpush3.msra.mxu1 %v726_v16  ;;  %1461 = vmatpush3.msra.mxu0 %v831_v27  ;;  %v1334_v27 = vld [vmem:[%s621_s21] ss:$0 sm:$0xff] }
  0xa6   : > { %1437 = vmatprep.subr.mxu1 %v725_v17  ;;  %1462 = vmatprep.subr.mxu0 %v830_v28 }
  0xa7   : > { %1438 = vmatpush3.msra.mxu1 %v725_v17  ;;  %1463 = vmatpush3.msra.mxu0 %v830_v28 }
  0xa8   : > { %1439 = vmatprep.subr.mxu1 %v724_v18  ;;  %1464 = vmatprep.subr.mxu0 %v829_v29 }
  0xa9   : > { %1440 = vmatpush3.msra.mxu1 %v724_v18  ;;  %1465 = vmatpush3.msra.mxu0 %v829_v29 }
  0xaa   : > { %1441 = vmatprep.subr.mxu1 %v723_v19  ;;  %1466 = vmatprep.subr.mxu0 %v828_v30 }
  0xab   : > { %1442 = vmatpush3.msra.mxu1 %v723_v19  ;;  %1467 = vmatpush3.msra.mxu0 %v828_v30 }
  0xac   : > { %1443 = vmatprep.subr.mxu1 %v722_v20  ;;  %1468 = vmatprep.subr.mxu0 %v827_v31 }
  0xad   : > { %1444 = vmatpush3.msra.mxu1 %v722_v20  ;;  %1469 = vmatpush3.msra.mxu0 %v827_v31 }
  0xae   : > { %1445 = vmatprep.subr.mxu1 %v721_v21  ;;  %1470 = vmatprep.subr.mxu0 %v826_v32 }
  0xaf   : > { %1446 = vmatpush3.msra.mxu1 %v721_v21  ;;  %1471 = vmatpush3.msra.mxu0 %v826_v32 }
  0xb0   : > { %1447 = vmatprep.subr.mxu1 %v720_v22  ;;  %1472 = vmatprep.subr.mxu0 %v825_v33 }
  0xb1   : > { %1448 = vmatpush3.msra.mxu1 %v720_v22  ;;  %1473 = vmatpush3.msra.mxu0 %v825_v33 }
  0xb2   : > { %1474 = vmatprep.subr.mxu0 %v824_v34  ;;  %922 = vperm.xlu0 %1602, %v918_v45  }
  0xb3   : > { %1475 = vmatpush3.msra.mxu0 %v824_v34 }
  0xb4   : > { %1476 = vmatprep.subr.mxu0 %v823_v41 }
  0xb5   : > { %1477 = vmatpush3.msra.mxu0 %v823_v41 }
  0xb6   : > { %1478 = vmatprep.subr.mxu0 %v822_v42  ;;  %927 = vperm.xlu0 %1602, %v919_v47  }
  0xb7   : > { %1479 = vmatpush3.msra.mxu0 %v822_v42 }
  0xb8   : > { %1480 = vmatprep.subr.mxu0 %v821_v43 }
  0xb9   : > { %1481 = vmatpush3.msra.mxu0 %v821_v43 }
  0xba   : > { %1482 = vmatprep.subr.mxu0 %v820_v44 }
  0xbb   : > { %1483 = vmatpush3.msra.mxu0 %v820_v44 }
 0x12d   : > { %v923_v55 = vpop.permute.xlu0 %922 }
 0x131   : > { %v928_v59 = vpop.permute.xlu0 %927 }
 0x15b   : > { %v1416_v35 = vpop.f32.mrf.mxu0 }
 0x15c   : > { %v717_v40 = vadd.f32 %v1416_v35, %v637_v37 }
 0x15d   : > { %v711_v38 = vpop.f32.mrf.mxu0 }
 0x15e   : > { %v712_v39 = vadd.f32 %v711_v38, %v636_v36 }
 0x160   : > { %1449 = vmatprep.mubr.f32.mxu1 %v712_v39 }
 0x161   : > { %1450 = vmatmul.mubr.f32.vlgmr.msra.gmra.mxu1 %v717_v40 }
 0x221   : > { %v1451_v49 = vpop.f32.mrf.mxu1 }
 0x222   : > { %v815_v50 = vadd.f32 %v1451_v49, %v1331_v48 }
 0x223   : > { %v809_v51 = vpop.f32.mrf.mxu1 }
 0x224   : > { %v810_v52 = vadd.f32 %v1331_v48, %v809_v51  ;;  %v819_v54 = vmax.f32 %v815_v50, 0.0 }
 0x226   : > { %v818_v53 = vmax.f32 %v810_v52, 0.0 }
 0x228   : > { %1484 = vmatprep.mubr.f32.mxu0 %v818_v53 }
 0x229   : > { %1485 = vmatmul.mubr.f32.vlgmr.msra.gmra.mxu0 %v819_v54 }
 0x2e9   : > { %v1486_v57 = vpop.f32.mrf.mxu0 }
 0x2ea   : > { %v915_v58 = vadd.f32 %v1486_v57, %v1332_v56 }
 0x2eb   : > { %v909_v60 = vpop.f32.mrf.mxu0 }
 0x2ec   : > { %v931_v61 = vmul.f32 %v928_v59, %v915_v58  ;;  %v910_v62 = vadd.f32 %v1332_v56, %v909_v60 }
 0x2ee   : > { %v930_v63 = vmul.f32 %v923_v55, %v910_v62  ;;  %v941_v0 = vmul.f32 %v931_v61, %v931_v61 }
 0x2f0   : > { %v932_v1 = vadd.f32 %v931_v61, %v930_v63  ;;  %v940_v2 = vmul.f32 %v930_v63, %v930_v63 }
 0x2f2   : > { %v933_v3 = vrot.slane %v932_v1, 4  ;;  %v942_v4 = vadd.f32 %v941_v0, %v940_v2 }
 0x2f4   : > { %v934_v5 = vadd.f32 %v933_v3, %v932_v1  ;;  %v943_v6 = vrot.slane %v942_v4, 4 }
 0x2f6   : > { %v935_v7 = vrot.slane %v934_v5, 2  ;;  %v944_v8 = vadd.f32 %v943_v6, %v942_v4 }
 0x2f8   : > { %v936_v9 = vadd.f32 %v935_v7, %v934_v5  ;;  %v945_v10 = vrot.slane %v944_v8, 2 }
 0x2fa   : > { %v937_v11 = vrot.slane %v936_v9, 1  ;;  %v946_v12 = vadd.f32 %v945_v10, %v944_v8 }
 0x2fc   : > { %v938_v13 = vadd.f32 %v937_v11, %v936_v9  ;;  %v947_v14 = vrot.slane %v946_v12, 1 }
 0x2fe   : > { %v939_v15 = vmul.f32 0.0625, %v938_v13  ;;  %v948_v16 = vadd.f32 %v947_v14, %v946_v12 }
 0x300   : > { %v949_v17 = vmul.f32 0.0625, %v948_v16  ;;  %v950_v18 = vmul.f32 %v939_v15, %v939_v15  ;;  %v952_v21 = vsub.f32 %v910_v62, %v939_v15  ;;  %v953_v22 = vsub.f32 %v915_v58, %v939_v15 }
 0x302   : > { %v951_v19 = vsub.f32 %v949_v17, %v950_v18 }
 0x304   : > { %v954_v20 = vadd.f32 1e-05, %v951_v19 }
 0x306   : > { %1603 = vrsqrt.f32 %v954_v20 }
 0x313   : > { %v1604_v23 = vpop.eup %1603 }
 0x314   : > { %v956_v25 = vmul.f32 %v1604_v23, %v952_v21  ;;  %v957_v26 = vmul.f32 %v1604_v23, %v953_v22  ;;  %980 = sbr.rel (%p1335_p11) target bundleno = 797 (0x31d), region = 100 }
 0x316   : > { %v965_v28 = vmul.f32 %v1333_v24, %v956_v25  ;;  %v966_v29 = vmul.f32 %v1333_v24, %v957_v26 }
 0x318   : > { %v974_v30 = vadd.f32 %v1334_v27, %v965_v28  ;;  %v975_v31 = vadd.f32 %v1334_v27, %v966_v29 }
 0x31a   : > { %v981_v32 = vmax.f32 %v974_v30, 0.0  ;;  %v982_v33 = vmax.f32 %v975_v31, 0.0 }
 0x31c   : > { %983 = vst [vmem:[#allocation2] sm:$0xff] %v981_v32  ;;  %984 = vst [vmem:[#allocation2 + $0x8] sm:$0xff] %v982_v33 }
 0x31d PF: > { %p1336_p12 = scmp.ne.s32.totalorder %s1970_s13, 1 }
 0x31e   : > { %s2279_s21 = sld [smem:[#allocation23_spill]] (!%p1336_p12) }
 0x31f   : > { %987 = sbr.rel (%p1336_p12) target bundleno = 1200 (0x4b0), region = 104  ;;  %s2280_s16 = sld [smem:[#allocation24_spill]] (!%p1336_p12) }
 0x320   : > { %s2281_s20 = sld [smem:[#allocation25_spill]] (!%p1336_p12) }
 0x324   : > { %v988_v34 = vld [vmem:[%s2279_s21] sm:$0xf]  ;;  %v1795_v36 = vmov 0.0   ;;  %vm1796_vm1 = vmmov 0   ;;  %v1797_v38 = vmov 0   ;;  %v1085_v39 = vld [vmem:[#allocation9 + $0x78] sm:$0xff] }
 0x325   : > { %v1063_v35 = vld [vmem:[%s2280_s16] sm:$0xff]  ;;  %1487 = vmatprep.subr.mxu0 %v1795_v36  ;;  %1491 = vmatprep.mubr.msk.f32.mxu0 %vm1796_vm1, %v1795_v36  ;;  %v989_v37 = vunpack.c.l.bf16 %v988_v34  ;;  %v1083_v41 = vld [vmem:[#allocation9 + $0x68] sm:$0xff]  ;;  %v1082_v42 = vld [vmem:[#allocation9 + $0x60] sm:$0xff] }
 0x326   : > { %1488 = vmatpush3.msra.mxu0 %v975_v31  ;;  %1605 = vset.pattern.permute.xlu0 %v1797_v38  ;;  %v1084_v40 = vld [vmem:[#allocation9 + $0x70] sm:$0xff]  ;;  %v1081_v43 = vld [vmem:[#allocation9 + $0x58] sm:$0xff]  ;;  %v1079_v45 = vld [vmem:[#allocation9 + $0x48] sm:$0xff] }
 0x327   : > { %1489 = vmatprep.subr.mxu0 %v1795_v36  ;;  %1066 = vperm.xlu0 %1605, %v1063_v35   ;;  %v1080_v44 = vld [vmem:[#allocation9 + $0x50] sm:$0xff]  ;;  %v1078_v46 = vld [vmem:[#allocation9 + $0x40] sm:$0xff]  ;;  %v1077_v47 = vld [vmem:[#allocation9 + $0x38] sm:$0xff] }
 0x328   : > { %1490 = vmatpush3.msra.mxu0 %v974_v30  ;;  %1494 = vmatprep.subr.mxu1 %v1795_v36  ;;  %v1076_v48 = vld [vmem:[#allocation9 + $0x30] sm:$0xff]  ;;  %v1075_v49 = vld [vmem:[#allocation9 + $0x28] sm:$0xff]  ;;  %v1074_v50 = vld [vmem:[#allocation9 + $0x20] sm:$0xff] }
 0x329   : > { %1492 = vmatmul.mubr.msk.f32.vlgmr.msra.gmra.mxu0 %vm638_vm0, %v989_v37  ;;  %1495 = vmatpush3.msra.mxu1 %v1085_v39  ;;  %v1073_v51 = vld [vmem:[#allocation9 + $0x18] sm:$0xff]  ;;  %v1072_v52 = vld [vmem:[#allocation9 + $0x10] sm:$0xff]  ;;  %v1071_v53 = vld [vmem:[#allocation9 + $0x8] sm:$0xff] }
 0x32a   : > { %1496 = vmatprep.subr.mxu1 %v1795_v36  ;;  %1526 = vmatprep.mubr.msk.f32.mxu1 %vm1796_vm1, %v1795_v36  ;;  %v1070_v54 = vld [vmem:[#allocation9] sm:$0xff]  ;;  %v1338_v59 = vld [vmem:[%s2281_s20] ss:$0 sm:$0xff] }
 0x32b   : > { %1497 = vmatpush3.msra.mxu1 %v1084_v40 }
 0x32c   : > { %1498 = vmatprep.subr.mxu1 %v1795_v36 }
 0x32d   : > { %1499 = vmatpush3.msra.mxu1 %v1083_v41 }
 0x32e   : > { %1500 = vmatprep.subr.mxu1 %v1795_v36 }
 0x32f   : > { %1501 = vmatpush3.msra.mxu1 %v1082_v42 }
 0x330   : > { %1502 = vmatprep.subr.mxu1 %v1795_v36 }
 0x331   : > { %1503 = vmatpush3.msra.mxu1 %v1081_v43 }
 0x332   : > { %1504 = vmatprep.subr.mxu1 %v1795_v36 }
 0x333   : > { %1505 = vmatpush3.msra.mxu1 %v1080_v44 }
 0x334   : > { %1506 = vmatprep.subr.mxu1 %v1795_v36 }
 0x335   : > { %1507 = vmatpush3.msra.mxu1 %v1079_v45 }
 0x336   : > { %1508 = vmatprep.subr.mxu1 %v1795_v36 }
 0x337   : > { %1509 = vmatpush3.msra.mxu1 %v1078_v46 }
 0x338   : > { %1510 = vmatprep.subr.mxu1 %v1795_v36 }
 0x339   : > { %1511 = vmatpush3.msra.mxu1 %v1077_v47 }
 0x33a   : > { %1512 = vmatprep.subr.mxu1 %v1795_v36 }
 0x33b   : > { %1513 = vmatpush3.msra.mxu1 %v1076_v48 }
 0x33c   : > { %1514 = vmatprep.subr.mxu1 %v1795_v36 }
 0x33d   : > { %1515 = vmatpush3.msra.mxu1 %v1075_v49 }
 0x33e   : > { %1516 = vmatprep.subr.mxu1 %v1795_v36 }
 0x33f   : > { %1517 = vmatpush3.msra.mxu1 %v1074_v50 }
 0x340   : > { %1518 = vmatprep.subr.mxu1 %v1795_v36 }
 0x341   : > { %1519 = vmatpush3.msra.mxu1 %v1073_v51 }
 0x342   : > { %1520 = vmatprep.subr.mxu1 %v1795_v36 }
 0x343   : > { %1521 = vmatpush3.msra.mxu1 %v1072_v52 }
 0x344   : > { %1522 = vmatprep.subr.mxu1 %v1795_v36 }
 0x345   : > { %1523 = vmatpush3.msra.mxu1 %v1071_v53 }
 0x346   : > { %1524 = vmatprep.subr.mxu1 %v1795_v36 }
 0x347   : > { %1525 = vmatpush3.msra.mxu1 %v1070_v54 }
 0x3a2   : > { %v1067_v55 = vpop.permute.xlu0 %1066 }
 0x3e9   : > { %v1059_v56 = vpop.f32.mrf.mxu0 }
 0x3ea   : > { %v1069_v57 = vmul.f32 %v1067_v55, %v1059_v56 }
 0x3eb   : > { %v1493_v58 = vpop.f32.mrf.mxu0 }
 0x3ec   : > { %1527 = vmatmul.mubr.f32.vlgmr.msra.gmra.mxu1 %v1069_v57 }
 0x4ac   : > { %v1159_v60 = vpop.f32.mrf.mxu1 }
 0x4ad   : > { %v1160_v61 = vadd.f32 %v1338_v59, %v1159_v60 }
 0x4ae   : > { %v1528_v62 = vpop.f32.mrf.mxu1 }
 0x4af   : > { %1163 = vst [vmem:[#allocation11] sm:$0xff] %v1160_v61 }
 0x4b0 PF: > { %s1798_s11 = smov [#allocation11]  }
 0x4b1   : > { %s1171_s10 = sshll.u32 %s1798_s11, 4  ;;  %s1172_s10 = int_to_ptr.vmem [resolvable:$true] %s1171_s10 }
 0x4b2   : > { %s1716_s26 = scalar_lea.vmem %s1172_s10, 128  ;;  %p1723_p6 = scmp.lt.s32.totalorder %s1172_s10, %s1172_s10 }
 0x4b3   : > { %p1717_p3 = scmp.ne.s32.totalorder %s1172_s10, %s1716_s26  ;;  %p1724_p13 = scmp.lt.s32.totalorder %s1716_s26, %s1716_s26 }
 0x4b5   : > { %p1718_p2 = pnand %p1717_p3, %p1335_p11  ;;  %p1725_p8 = por %p1724_p13, %p1723_p6 }
 0x4b7   : > { %p1719_p4 = pneg %p1718_p2 }
 0x4b9   : > { %p1726_p7 = pnand %p1725_p8, %p1719_p4 }
 0x4bb   : > { %1729 = shalt.err (!%p1726_p7)
}
 0x4bc   : > { %s2282_s22 = sld [smem:[#allocation26_spill]] }
 0x4c2   : > { %1540 = dma.vmem_to_hbm [thread:$0]  (%p1335_p11), %s1172_s10, 128, %s2282_s22, [#allocation5]  }
 0x4c3   : > { %1769 = dma.done.wait (%p1335_p11), [#allocation5], 128  }
 0x4c4   : > { %1771 = vsyncadd (%p1335_p11), [#allocation5], 4294967168 }
 0x4c5 PF: > { %s2283_s16 = sld [smem:[#allocation17_spill]]  ;;  %s2286_s29 = smov %s1778_s30 }
 0x4c6   : > { %s2284_s17 = sld [smem:[#allocation16_spill]] }
 0x4c7   : > { %s2285_s15 = sld [smem:[#allocation18_spill]] }
 0x4cb   : > { %p29_p9 = scmp.ge.s32.totalorder %s2283_s16, 4  }
 0x4cc   : > { %s2287_s30 = smov %s2284_s17 }
 0x4cd   :  { %31 = sbr.rel (!%p29_p9) target bundleno = 16 (0x10), region = 165 }
 0x4d2   :  { %1184 = vsyncpa [#allocation4], 1 }
 0x4d3   :  { %1186 = vsyncpa [#allocation4 + $0x1], 1 }
 0x4d4   :  { %1187 = vsyncpa [#allocation7], 1 }
 0x4d5   :  { %1189 = vsyncpa [#allocation7 + $0x1], 1 }
 0x4d6   :  { %1190 = vsyncpa [#allocation10], 1 }
 0x4d7   :  { %1191 = vsyncpa [#allocation5], 1 }
 0x4d8   :  { %1193 = vsyncpa [#allocation5 + $0x1], 1 }

</bundles_post_ra>
